<compile_context>
chip_gen: v7x
topology: tpu7x:2x2x1
jax: 0.10.0
libtpu: 0.0.40
codegen_flags: <defaults>
</compile_context>

<pallas_src>
import jax
import jax.numpy as jnp
from jax.experimental import pallas as pl
from jax.experimental.pallas import tpu as pltpu

EPS = 1e-5


def _round_up(n, m):
    return (n + m - 1) // m * m


def projection_kernel(x_ref, w1_ref, gb_ref, w2_ref, o_ref):
    # x: (B, Dp) input dtype; w1/w2: (Dp, Dp) matmul dtype (pre-transposed = W^T);
    # gb: (2, Dp) f32 = [gamma; beta].
    B = x_ref.shape[0]
    Dp = x_ref.shape[1]
    inv_b = 1.0 / B

    x = x_ref[...]

    # ---- Linear 1 (no bias) on the MXU: low-precision operands, f32 accumulation.
    y1 = jnp.dot(x.astype(w1_ref.dtype), w1_ref[...],
                 preferred_element_type=jnp.float32)

    # ---- BatchNorm1d (affine), batch stats. Fused single XLU reduction for
    #      sum and sum-of-squares; f32 VPU math.
    s1 = jnp.sum(jnp.concatenate([y1, y1 * y1], axis=1), axis=0, keepdims=True)
    mean1 = s1[:, :Dp] * inv_b
    var1 = s1[:, Dp:] * inv_b - mean1 * mean1
    gamma = gb_ref[0:1, :]
    beta = gb_ref[1:2, :]
    y1n = (y1 - mean1) * jax.lax.rsqrt(var1 + EPS) * gamma + beta

    # ---- ReLU
    h = jnp.maximum(y1n, 0.0)

    # ---- Linear 2 (no bias) on the MXU.
    y2 = jnp.dot(h.astype(w2_ref.dtype), w2_ref[...],
                 preferred_element_type=jnp.float32)

    # ---- BatchNorm1d (affine=False), batch stats, fused reduction.
    s2 = jnp.sum(jnp.concatenate([y2, y2 * y2], axis=1), axis=0, keepdims=True)
    mean2 = s2[:, :Dp] * inv_b
    var2 = s2[:, Dp:] * inv_b - mean2 * mean2
    o_ref[...] = ((y2 - mean2) * jax.lax.rsqrt(var2 + EPS)).astype(o_ref.dtype)


class ProjectionParams:
    """One-time (module-init) preparation of Projection parameters.

    Pads the feature axis to a lane-dense multiple of 128, casts the weights to
    the MXU dtype, and packs gamma/beta into a single (2, Dp) f32 slab. Doing this
    here keeps the per-forward HBM traffic to exactly what the kernel reads.
    Weights are stored pre-transposed as (in_features, out_features) = W^T.
    """

    def __init__(self, w1_t, gamma, beta, w2_t, matmul_dtype=jnp.bfloat16):
        D = w1_t.shape[0]
        assert w1_t.shape == (D, D) and w2_t.shape == (D, D)
        assert gamma.shape == (D,) and beta.shape == (D,)

        Dp = _round_up(D, 128)
        pad = Dp - D
        if pad:
            # NOTE: padding MUST be zero-fill. Padded gamma/beta columns == 0 is what
            # keeps padded feature columns exactly zero through BN1/ReLU/matmul2/BN2.
            w1_t = jnp.pad(w1_t, ((0, pad), (0, pad)))
            w2_t = jnp.pad(w2_t, ((0, pad), (0, pad)))
            gamma = jnp.pad(gamma, (0, pad))
            beta = jnp.pad(beta, (0, pad))

        self.D = D
        self.Dp = Dp
        self.matmul_dtype = jnp.dtype(matmul_dtype)
        self.w1 = jax.device_put(w1_t.astype(matmul_dtype))
        self.w2 = jax.device_put(w2_t.astype(matmul_dtype))
        self.gb = jax.device_put(
            jnp.stack([gamma, beta], axis=0).astype(jnp.float32))  # (2, Dp)


def _vmem_limit_bytes(B, Dp, x_bytes, w_bytes):
    # Live buffers: x input block + its matmul-dtype copy, ~10 f32 (B, Dp)
    # intermediates (y1, concat stats, normalized, h, y2, concat stats, out, slack),
    # h's matmul-dtype copy, both weight panels (grid=() -> single-buffered), and
    # the gamma/beta slab padded to 8 sublanes.
    live = (B * Dp * (x_bytes + w_bytes)
            + 10 * B * Dp * 4
            + B * Dp * w_bytes
            + 2 * Dp * Dp * w_bytes
            + 8 * Dp * 4)
    try:
        cap = int(0.8 * pltpu.get_tpu_info().vmem_capacity_bytes)
    except Exception:
        cap = int(0.8 * (64 << 20))  # assume the smallest generation (v7x) if unknown
    return int(min(max(int(1.5 * live), 8 << 20), cap))


def projection_forward(x, params: ProjectionParams):
    """bn2(w2(relu(bn1(w1(x))))) with training-mode batch statistics."""
    B, D = x.shape
    assert D == params.D
    assert B >= 2, "BatchNorm batch statistics need at least 2 rows"

    Dp = params.Dp
    pad = Dp - D
    if pad:
        x = jnp.pad(x, ((0, 0), (0, pad)))
    # x is passed in its incoming dtype (f32 or bf16); the MXU cast happens in-kernel.

    vmem_limit = _vmem_limit_bytes(B, Dp, jnp.dtype(x.dtype).itemsize,
                                   params.matmul_dtype.itemsize)

    full = lambda shape: pl.BlockSpec(shape, lambda: (0,) * len(shape))
    out = pl.pallas_call(
        projection_kernel,
        out_shape=jax.ShapeDtypeStruct((B, Dp), jnp.float32),
        grid=(),
        in_specs=[
            full((B, Dp)),    # x
            full((Dp, Dp)),   # w1^T  (matmul dtype)
            full((2, Dp)),    # [gamma; beta]
            full((Dp, Dp)),   # w2^T  (matmul dtype)
        ],
        out_specs=full((B, Dp)),
        compiler_params=pltpu.CompilerParams(vmem_limit_bytes=vmem_limit),
    )(x, params.w1, params.gb, params.w2)

    return out[:, :D] if pad else out


def projection_reference(x, w1_t, gamma, beta, w2_t, matmul_dtype=jnp.float32):
    dot = lambda a, b: jnp.dot(a.astype(matmul_dtype), b.astype(matmul_dtype),
                               preferred_element_type=jnp.float32)
    y1 = dot(x, w1_t)
    m1 = y1.mean(0, keepdims=True)
    v1 = ((y1 - m1) ** 2).mean(0, keepdims=True)
    h = jnp.maximum((y1 - m1) * jax.lax.rsqrt(v1 + EPS) * gamma + beta, 0.0)
    y2 = dot(h, w2_t)
    m2 = y2.mean(0, keepdims=True)
    v2 = ((y2 - m2) ** 2).mean(0, keepdims=True)
    return (y2 - m2) * jax.lax.rsqrt(v2 + EPS)


if __name__ == "__main__":
    B = 8          # batch size
    D = 32         # pts_embedding

    key = jax.random.PRNGKey(0)
    kx, kw1, kw2, kg, kb = jax.random.split(key, 5)

    x = jax.random.normal(kx, (B, D), dtype=jnp.float32)
    # Deterministic parameter init (synthetic). Stored as (in, out) = W^T.
    w1_t = jax.random.normal(kw1, (D, D), dtype=jnp.float32) * 0.1
    w2_t = jax.random.normal(kw2, (D, D), dtype=jnp.float32) * 0.1
    gamma = 1.0 + 0.1 * jax.random.normal(kg, (D,), dtype=jnp.float32)
    beta = 0.1 * jax.random.normal(kb, (D,), dtype=jnp.float32)

    # Prepare (pad + cast + pack) the parameters ONCE, outside the per-call path.
    params = ProjectionParams(w1_t, gamma, beta, w2_t)

    out = projection_forward(x, params)
    out = jax.block_until_ready(out)
    assert out.shape == (B, D)

    # Tight check vs a reference using the same bf16-operand / f32-accumulate matmuls.
    ref_bf16 = projection_reference(x, w1_t, gamma, beta, w2_t,
                                    matmul_dtype=jnp.bfloat16)
    assert jnp.allclose(out, ref_bf16, atol=5e-3, rtol=5e-3), \
        "mismatch vs bf16-operand reference"

    # Looser sanity check vs the exact f32 forward (bf16 MXU operands introduce
    # ~bf16-epsilon-level perturbations on the O(1) normalized outputs).
    ref_f32 = projection_reference(x, w1_t, gamma, beta, w2_t)
    assert jnp.allclose(out, ref_f32, atol=6e-2, rtol=6e-2), \
        "mismatch vs f32 reference"

    print("KERNEL_OK")
</pallas_src>

<mosaic_0001>
module attributes {stable_mosaic.version = 11 : i64} {
  func.func @projection_kernel(%arg0: memref<8x128xf32, #tpu.memory_space<vmem>>, %arg1: memref<128x128xbf16, #tpu.memory_space<vmem>>, %arg2: memref<2x128xf32, #tpu.memory_space<vmem>>, %arg3: memref<128x128xbf16, #tpu.memory_space<vmem>>, %arg4: memref<8x128xf32, #tpu.memory_space<vmem>>) attributes {dimension_semantics = [], scalar_prefetch = 0 : i64, scratch_operands = 0 : i64, tpu.core_type = #tpu.core_type<tc>} {
    %c0 = arith.constant 0 : index
    %c0_0 = arith.constant 0 : index
    %0 = vector.load %arg0[%c0, %c0_0] : memref<8x128xf32, #tpu.memory_space<vmem>>, vector<8x128xf32>
    %1 = arith.truncf %0 : vector<8x128xf32> to vector<8x128xbf16>
    %c0_1 = arith.constant 0 : index
    %c0_2 = arith.constant 0 : index
    %2 = vector.load %arg1[%c0_1, %c0_2] : memref<128x128xbf16, #tpu.memory_space<vmem>>, vector<128x128xbf16>
    %cst = arith.constant dense<0.000000e+00> : vector<8x128xf32>
    %3 = tpu.matmul %1, %2, %cst {dimension_numbers = #tpu.dot_dimension_numbers<[1], [0], [0], [1], [0, 0, 1, 1], [], []>} : vector<8x128xbf16>, vector<128x128xbf16>, vector<8x128xf32> -> vector<8x128xf32>
    %4 = arith.mulf %3, %3 : vector<8x128xf32>
    %5 = tpu.concatenate %3, %4 in 1 : vector<8x128xf32>, vector<8x128xf32> -> vector<8x256xf32>
    %cst_3 = arith.constant dense<0.000000e+00> : vector<256xf32>
    %6 = vector.multi_reduction <add>, %5, %cst_3 [0] : vector<8x256xf32> to vector<256xf32>
    %7 = vector.shape_cast %6 : vector<256xf32> to vector<1x256xf32>
    %8 = vector.extract_strided_slice %7 {offsets = [0, 0], sizes = [1, 128], strides = [1, 1]} : vector<1x256xf32> to vector<1x128xf32>
    %cst_4 = arith.constant 1.250000e-01 : f32
    %9 = vector.broadcast %cst_4 : f32 to vector<1x128xf32>
    %10 = arith.mulf %8, %9 : vector<1x128xf32>
    %11 = vector.extract_strided_slice %7 {offsets = [0, 128], sizes = [1, 128], strides = [1, 1]} : vector<1x256xf32> to vector<1x128xf32>
    %cst_5 = arith.constant 1.250000e-01 : f32
    %12 = vector.broadcast %cst_5 : f32 to vector<1x128xf32>
    %13 = arith.mulf %11, %12 : vector<1x128xf32>
    %14 = arith.mulf %10, %10 : vector<1x128xf32>
    %15 = arith.subf %13, %14 : vector<1x128xf32>
    %c0_6 = arith.constant 0 : index
    %c0_7 = arith.constant 0 : index
    %16 = vector.load %arg2[%c0_6, %c0_7] : memref<2x128xf32, #tpu.memory_space<vmem>>, vector<1x128xf32>
    %c1 = arith.constant 1 : index
    %c0_8 = arith.constant 0 : index
    %17 = vector.load %arg2[%c1, %c0_8] : memref<2x128xf32, #tpu.memory_space<vmem>>, vector<1x128xf32>
    %18 = vector.broadcast %10 : vector<1x128xf32> to vector<8x128xf32>
    %19 = arith.subf %3, %18 : vector<8x128xf32>
    %cst_9 = arith.constant 9.99999974E-6 : f32
    %20 = vector.broadcast %cst_9 : f32 to vector<1x128xf32>
    %21 = arith.addf %15, %20 : vector<1x128xf32>
    %22 = math.rsqrt %21 : vector<1x128xf32>
    %23 = vector.broadcast %22 : vector<1x128xf32> to vector<8x128xf32>
    %24 = arith.mulf %19, %23 : vector<8x128xf32>
    %25 = vector.broadcast %16 : vector<1x128xf32> to vector<8x128xf32>
    %26 = arith.mulf %24, %25 : vector<8x128xf32>
    %27 = vector.broadcast %17 : vector<1x128xf32> to vector<8x128xf32>
    %28 = arith.addf %26, %27 : vector<8x128xf32>
    %cst_10 = arith.constant 0.000000e+00 : f32
    %29 = vector.broadcast %cst_10 : f32 to vector<8x128xf32>
    %30 = arith.maximumf %28, %29 : vector<8x128xf32>
    %31 = arith.truncf %30 : vector<8x128xf32> to vector<8x128xbf16>
    %c0_11 = arith.constant 0 : index
    %c0_12 = arith.constant 0 : index
    %32 = vector.load %arg3[%c0_11, %c0_12] : memref<128x128xbf16, #tpu.memory_space<vmem>>, vector<128x128xbf16>
    %cst_13 = arith.constant dense<0.000000e+00> : vector<8x128xf32>
    %33 = tpu.matmul %31, %32, %cst_13 {dimension_numbers = #tpu.dot_dimension_numbers<[1], [0], [0], [1], [0, 0, 1, 1], [], []>} : vector<8x128xbf16>, vector<128x128xbf16>, vector<8x128xf32> -> vector<8x128xf32>
    %34 = arith.mulf %33, %33 : vector<8x128xf32>
    %35 = tpu.concatenate %33, %34 in 1 : vector<8x128xf32>, vector<8x128xf32> -> vector<8x256xf32>
    %cst_14 = arith.constant dense<0.000000e+00> : vector<256xf32>
    %36 = vector.multi_reduction <add>, %35, %cst_14 [0] : vector<8x256xf32> to vector<256xf32>
    %37 = vector.shape_cast %36 : vector<256xf32> to vector<1x256xf32>
    %38 = vector.extract_strided_slice %37 {offsets = [0, 0], sizes = [1, 128], strides = [1, 1]} : vector<1x256xf32> to vector<1x128xf32>
    %cst_15 = arith.constant 1.250000e-01 : f32
    %39 = vector.broadcast %cst_15 : f32 to vector<1x128xf32>
    %40 = arith.mulf %38, %39 : vector<1x128xf32>
    %41 = vector.extract_strided_slice %37 {offsets = [0, 128], sizes = [1, 128], strides = [1, 1]} : vector<1x256xf32> to vector<1x128xf32>
    %cst_16 = arith.constant 1.250000e-01 : f32
    %42 = vector.broadcast %cst_16 : f32 to vector<1x128xf32>
    %43 = arith.mulf %41, %42 : vector<1x128xf32>
    %44 = arith.mulf %40, %40 : vector<1x128xf32>
    %45 = arith.subf %43, %44 : vector<1x128xf32>
    %46 = vector.broadcast %40 : vector<1x128xf32> to vector<8x128xf32>
    %47 = arith.subf %33, %46 : vector<8x128xf32>
    %cst_17 = arith.constant 9.99999974E-6 : f32
    %48 = vector.broadcast %cst_17 : f32 to vector<1x128xf32>
    %49 = arith.addf %45, %48 : vector<1x128xf32>
    %50 = math.rsqrt %49 : vector<1x128xf32>
    %51 = vector.broadcast %50 : vector<1x128xf32> to vector<8x128xf32>
    %52 = arith.mulf %47, %51 : vector<8x128xf32>
    %c0_18 = arith.constant 0 : index
    %c0_19 = arith.constant 0 : index
    %53 = vector.load %arg4[%c0_18, %c0_19] : memref<8x128xf32, #tpu.memory_space<vmem>>, vector<8x128xf32>
    tpu.vector_store %arg4[%c0_18, %c0_19], %52 {strides = array<i32>} : memref<8x128xf32, #tpu.memory_space<vmem>>, vector<8x128xf32>,
    return
  }
}

</mosaic_0001>

<bundles_post_ra>
// kernel: tpu_custom_call.1
= control target key start
LH: loop header
LB: loop body
LE: loop exit
PB: predicated region body
PF: predicated region fallthrough
CT: control target
= control target key end

     0   :  { %9 = vsyncpa [#allocation3], 0  ;;  %s632_s0 = inlined_call_operand.hbm [shape: f32[8,128], index: 0, kind: input, shape index: {}]   ;;  %s633_s1 = inlined_call_operand.hbm [shape: bf16[128,128], index: 1, kind: input, shape index: {}]   ;;  %s634_s2 = inlined_call_operand.vmem [shape: f32[2,128], index: 2, kind: input, shape index: {}]   ;;  %s635_s3 = inlined_call_operand.hbm [shape: bf16[128,128], index: 3, kind: input, shape index: {}]   ;;  %s636_s4 = inlined_call_operand.hbm [shape: f32[8,128], index: 4, kind: output, shape index: {}]  }
   0x1   :  { %10 = vsyncpa [#allocation6], 0 }
   0x2   :  { %11 = vsyncpa [#allocation4], 0  ;;  %s539_s15 = smov [#allocation5]   ;;  %s445_s19 = scalar_lea.hbm %s633_s1, 1024 }
   0x3   :  { %s27_s16 = sshll.u32 %s539_s15, 4  ;;  %p446_p0 = scmp.ne.s32.totalorder %s633_s1, %s445_s19  ;;  %s28_s16 = int_to_ptr.vmem [resolvable:$true] %s27_s16 }
   0x4   :  { %p449_p1 = scmp.lt.u32.totalorder %s445_s19, %s633_s1 }
   0x6   :  { %p451_p2 = pnand %p449_p1, %p446_p0 }
   0x8   :  { %454 = shalt.err (!%p451_p2)
}
   0x9   :  { %s455_s24 = scalar_lea.vmem %s28_s16, 1024  ;;  %p460_p4 = scmp.lt.s32.totalorder %s28_s16, %s28_s16 }
   0xa   :  { %p456_p3 = scmp.ne.s32.totalorder %s28_s16, %s455_s24  ;;  %p461_p5 = scmp.lt.s32.totalorder %s455_s24, %s455_s24 }
   0xc   :  { %p462_p6 = por %p461_p5, %p460_p4 }
   0xe   :  { %p463_p7 = pnand %p462_p6, %p456_p3 }
  0x10   :  { %466 = shalt.err (!%p463_p7)
}
  0x11   :  { %s540_s25 = smov 64   ;;  %s541_s26 = smov 4  }
  0x12   :  { %33 = dma.hbm_to_vmem [thread:$0]  %s633_s1, 1024, %s28_s16, [#allocation6], %s540_s25, %s540_s25, %s541_s26  }
  0x13   :  { %s542_s29 = smov [#allocation2]   ;;  %s543_s5 = smov [#allocation7]  }
  0x14   :  { %s18_s30 = sshll.u32 %s542_s29, 4  ;;  %s41_s6 = sshll.u32 %s543_s5, 4  ;;  %s19_s30 = int_to_ptr.vmem [resolvable:$true] %s18_s30  ;;  %s42_s6 = int_to_ptr.vmem [resolvable:$true] %s41_s6 }
  0x15   :  { %s467_s9 = scalar_lea.hbm %s632_s0, 128 }
  0x16   :  { %p468_p8 = scmp.ne.s32.totalorder %s632_s0, %s467_s9  ;;  %p471_p9 = scmp.lt.u32.totalorder %s467_s9, %s632_s0 }
  0x18   :  { %p473_p10 = pnand %p471_p9, %p468_p8 }
  0x1a   :  { %476 = shalt.err (!%p473_p10)
}
  0x1b   :  { %s477_s1 = scalar_lea.vmem %s19_s30, 128  ;;  %p482_p12 = scmp.lt.s32.totalorder %s19_s30, %s19_s30 }
  0x1c   :  { %p478_p11 = scmp.ne.s32.totalorder %s19_s30, %s477_s1  ;;  %p483_p13 = scmp.lt.s32.totalorder %s477_s1, %s477_s1 }
  0x1e   :  { %p484_p0 = por %p483_p13, %p482_p12 }
  0x20   :  { %p485_p1 = pnand %p484_p0, %p478_p11 }
  0x22   :  { %488 = shalt.err (!%p485_p1)
}
  0x23   :  { %21 = dma.hbm_to_vmem [thread:$0]  %s632_s0, 128, %s19_s30, [#allocation3]  }
  0x24   :  { %s489_s18 = scalar_lea.hbm %s635_s3, 1024 }
  0x25   :  { %p490_p2 = scmp.ne.s32.totalorder %s635_s3, %s489_s18  ;;  %p493_p3 = scmp.lt.u32.totalorder %s489_s18, %s635_s3 }
  0x27   :  { %p495_p4 = pnand %p493_p3, %p490_p2 }
  0x29   :  { %498 = shalt.err (!%p495_p4)
}
  0x2a   :  { %s499_s23 = scalar_lea.vmem %s42_s6, 1024  ;;  %p504_p6 = scmp.lt.s32.totalorder %s42_s6, %s42_s6 }
  0x2b   :  { %p500_p5 = scmp.ne.s32.totalorder %s42_s6, %s499_s23  ;;  %p505_p7 = scmp.lt.s32.totalorder %s499_s23, %s499_s23 }
  0x2d   :  { %p506_p8 = por %p505_p7, %p504_p6 }
  0x2f   :  { %p507_p9 = pnand %p506_p8, %p500_p5 }
  0x31   :  { %510 = shalt.err (!%p507_p9)
}
  0x32   :  { %47 = dma.hbm_to_vmem [thread:$0]  %s635_s3, 1024, %s42_s6, [#allocation6], %s540_s25, %s540_s25, %s541_s26  }
  0x33   :  { %533 = dma.done.wait [#allocation3], 128  }
  0x34   :  { %534 = vsyncadd [#allocation3], 4294967168 }
  0x35   :  { %535 = dma.done.wait [#allocation6], 2048  }
  0x36   :  { %536 = vsyncadd [#allocation6], 4294965248  ;;  %v544_v0 = vmov 0.0   ;;  %vm545_vm0 = vmmov 0   ;;  %v425_v1 = vld [vmem:[#allocation5] sm:$0xff]   ;;  %v426_v2 = vld [vmem:[#allocation5 + $0x8] sm:$0xff]  }
  0x37   :  { %377 = vmatprep.subr.bf16.mxu0 %v544_v0  ;;  %393 = vmatprep.mubr.msk.bf16.mxu0 %vm545_vm0, %v544_v0  ;;  %v427_v3 = vld [vmem:[#allocation5 + $0x10] sm:$0xff]   ;;  %v428_v4 = vld [vmem:[#allocation5 + $0x18] sm:$0xff]   ;;  %v429_v5 = vld [vmem:[#allocation5 + $0x20] sm:$0xff]  }
  0x38   :  { %397 = vmatprep.subr.bf16.mxu1 %v544_v0  ;;  %413 = vmatprep.mubr.msk.bf16.mxu1 %vm545_vm0, %v544_v0  ;;  %v430_v6 = vld [vmem:[#allocation5 + $0x28] sm:$0xff]   ;;  %v431_v7 = vld [vmem:[#allocation5 + $0x30] sm:$0xff]   ;;  %v432_v8 = vld [vmem:[#allocation5 + $0x38] sm:$0xff]  }
  0x39   :  { %378 = vmatpush3.bf16.msra.mxu0 %v425_v1  ;;  %v58_v9 = vld [vmem:[#allocation2] sm:$0xff]  ;;  %v433_v11 = vld [vmem:[#allocation7] sm:$0xff]   ;;  %v434_v12 = vld [vmem:[#allocation7 + $0x8] sm:$0xff]  }
  0x3a   :  { %379 = vmatprep.subr.bf16.mxu0 %v544_v0  ;;  %v59_v10 = vpack.c.bf16 %v58_v9, %v58_v9  ;;  %398 = vmatpush3.bf16.msra.mxu1 %v433_v11  ;;  %v435_v13 = vld [vmem:[#allocation7 + $0x10] sm:$0xff]   ;;  %v436_v14 = vld [vmem:[#allocation7 + $0x18] sm:$0xff]   ;;  %v437_v15 = vld [vmem:[#allocation7 + $0x20] sm:$0xff]  }
  0x3b   :  { %399 = vmatprep.subr.bf16.mxu1 %v544_v0  ;;  %v438_v16 = vld [vmem:[#allocation7 + $0x28] sm:$0xff]   ;;  %v439_v17 = vld [vmem:[#allocation7 + $0x30] sm:$0xff]   ;;  %v440_v18 = vld [vmem:[#allocation7 + $0x38] sm:$0xff]  }
  0x3c   :  { %v349_v43 = vld [vmem:[%s634_s2] ss:$0 sm:$0xff]  ;;  %v350_v45 = vld [vmem:[%s634_s2 + $0x1] ss:$0 sm:$0xff]  ;;  %s546_s2 = smov [#allocation8]  }
  0x3d   :  { %380 = vmatpush3.bf16.msra.mxu0 %v426_v2  ;;  %s331_s28 = sshll.u32 %s546_s2, 4  ;;  %s332_s28 = int_to_ptr.vmem [resolvable:$true] %s331_s28 }
  0x3e   :  { %381 = vmatprep.subr.bf16.mxu0 %v544_v0  ;;  %400 = vmatpush3.bf16.msra.mxu1 %v434_v12  ;;  %s511_s29 = scalar_lea.vmem %s332_s28, 128  ;;  %p516_p11 = scmp.lt.s32.totalorder %s332_s28, %s332_s28 }
  0x3f   :  { %401 = vmatprep.subr.bf16.mxu1 %v544_v0  ;;  %p512_p10 = scmp.ne.s32.totalorder %s332_s28, %s511_s29  ;;  %p517_p12 = scmp.lt.s32.totalorder %s511_s29, %s511_s29 }
  0x41   :  { %382 = vmatpush3.bf16.msra.mxu0 %v427_v3  ;;  %p518_p13 = por %p517_p12, %p516_p11 }
  0x42   :  { %383 = vmatprep.subr.bf16.mxu0 %v544_v0  ;;  %402 = vmatpush3.bf16.msra.mxu1 %v435_v13 }
  0x43   :  { %403 = vmatprep.subr.bf16.mxu1 %v544_v0  ;;  %p519_p0 = pnand %p518_p13, %p512_p10 }
  0x45   :  { %384 = vmatpush3.bf16.msra.mxu0 %v428_v4 }
  0x46   :  { %385 = vmatprep.subr.bf16.mxu0 %v544_v0  ;;  %404 = vmatpush3.bf16.msra.mxu1 %v436_v14 }
  0x47   :  { %405 = vmatprep.subr.bf16.mxu1 %v544_v0 }
  0x49   :  { %386 = vmatpush3.bf16.msra.mxu0 %v429_v5 }
  0x4a   :  { %387 = vmatprep.subr.bf16.mxu0 %v544_v0  ;;  %406 = vmatpush3.bf16.msra.mxu1 %v437_v15 }
  0x4b   :  { %407 = vmatprep.subr.bf16.mxu1 %v544_v0 }
  0x4d   :  { %388 = vmatpush3.bf16.msra.mxu0 %v430_v6 }
  0x4e   :  { %389 = vmatprep.subr.bf16.mxu0 %v544_v0  ;;  %408 = vmatpush3.bf16.msra.mxu1 %v438_v16 }
  0x4f   :  { %409 = vmatprep.subr.bf16.mxu1 %v544_v0 }
  0x51   :  { %390 = vmatpush3.bf16.msra.mxu0 %v431_v7 }
  0x52   :  { %391 = vmatprep.subr.bf16.mxu0 %v544_v0  ;;  %410 = vmatpush3.bf16.msra.mxu1 %v439_v17 }
  0x53   :  { %411 = vmatprep.subr.bf16.mxu1 %v544_v0 }
  0x55   :  { %392 = vmatpush3.bf16.msra.mxu0 %v432_v8 }
  0x56   :  { %412 = vmatpush3.bf16.msra.mxu1 %v440_v18 }
  0x58   :  { %394 = vmatmul.mubr.bf16.vlgmr.msra.gmra.mrb[0].mxu0 %v59_v10 }
 0x12b   :  { %v158_v19 = vpop.f32.mrb[0].mxu0 }
 0x12c   :  { %v164_v20 = vmul.f32 %v158_v19, %v158_v19  ;;  %v165_v21 = vrot.slane %v158_v19, 4  ;;  %v395_v22 = vpop.f32.mrb[1].mxu0 }
 0x12d   :  { %v161_v23 = vpop.f32.mrb[2].mxu0 }
 0x12e   :  { %v166_v24 = vadd.f32 %v165_v21, %v158_v19  ;;  %v171_v25 = vrot.slane %v164_v20, 4  ;;  %v396_v26 = vpop.f32.mrb[3].mxu0 }
 0x130   :  { %v167_v27 = vrot.slane %v166_v24, 2  ;;  %v172_v28 = vadd.f32 %v171_v25, %v164_v20 }
 0x132   :  { %v168_v29 = vadd.f32 %v167_v27, %v166_v24  ;;  %v173_v30 = vrot.slane %v172_v28, 2 }
 0x134   :  { %v169_v31 = vrot.slane %v168_v29, 1  ;;  %v174_v32 = vadd.f32 %v173_v30, %v172_v28 }
 0x136   :  { %v170_v33 = vadd.f32 %v169_v31, %v168_v29  ;;  %v175_v34 = vrot.slane %v174_v32, 1 }
 0x138   :  { %v176_v35 = vadd.f32 %v175_v34, %v174_v32  ;;  %v177_v36 = vmul.f32 0.125, %v170_v33 }
 0x13a   :  { %v178_v37 = vmul.f32 0.125, %v176_v35  ;;  %v179_v38 = vmul.f32 %v177_v36, %v177_v36  ;;  %v183_v41 = vsub.f32 %v158_v19, %v177_v36 }
 0x13c   :  { %v180_v39 = vsub.f32 %v178_v37, %v179_v38 }
 0x13e   :  { %v184_v40 = vadd.f32 1e-05, %v180_v39 }
 0x140   :  { %441 = vrsqrt.f32 %v184_v40 }
 0x14a   :  { %v442_v42 = vpop.eup %441 }
 0x14b   :  { %v186_v44 = vmul.f32 %v442_v42, %v183_v41 }
 0x14d   :  { %v191_v46 = vmul.f32 %v349_v43, %v186_v44 }
 0x14f   :  { %v196_v47 = vadd.f32 %v350_v45, %v191_v46 }
 0x151   :  { %v197_v48 = vmax.f32 %v196_v47, 0.0 }
 0x153   :  { %v198_v49 = vpack.c.bf16 %v197_v48, %v197_v48 }
 0x155   :  { %414 = vmatmul.mubr.bf16.vlgmr.msra.gmra.mrb[0].mxu1 %v198_v49 }
 0x228   :  { %v297_v50 = vpop.f32.mrb[0].mxu1 }
 0x229   :  { %v303_v51 = vmul.f32 %v297_v50, %v297_v50  ;;  %v304_v52 = vrot.slane %v297_v50, 4  ;;  %v415_v53 = vpop.f32.mrb[1].mxu1 }
 0x22a   :  { %v300_v54 = vpop.f32.mrb[2].mxu1 }
 0x22b   :  { %v305_v55 = vadd.f32 %v304_v52, %v297_v50  ;;  %v310_v56 = vrot.slane %v303_v51, 4  ;;  %v416_v57 = vpop.f32.mrb[3].mxu1 }
 0x22d   :  { %v306_v58 = vrot.slane %v305_v55, 2  ;;  %v311_v59 = vadd.f32 %v310_v56, %v303_v51 }
 0x22f   :  { %v307_v60 = vadd.f32 %v306_v58, %v305_v55  ;;  %v312_v61 = vrot.slane %v311_v59, 2 }
 0x231   :  { %v308_v62 = vrot.slane %v307_v60, 1  ;;  %v313_v63 = vadd.f32 %v312_v61, %v311_v59 }
 0x233   :  { %v314_v0 = vrot.slane %v313_v63, 1  ;;  %v309_v1 = vadd.f32 %v308_v62, %v307_v60 }
 0x235   :  { %v315_v2 = vadd.f32 %v314_v0, %v313_v63  ;;  %v316_v3 = vmul.f32 0.125, %v309_v1 }
 0x237   :  { %v317_v4 = vmul.f32 0.125, %v315_v2  ;;  %v318_v5 = vmul.f32 %v316_v3, %v316_v3  ;;  %v320_v8 = vsub.f32 %v297_v50, %v316_v3 }
 0x239   :  { %v319_v6 = vsub.f32 %v317_v4, %v318_v5 }
 0x23b   :  { %v321_v7 = vadd.f32 1e-05, %v319_v6 }
 0x23d   :  { %443 = vrsqrt.f32 %v321_v7 }
 0x247   :  { %v444_v9 = vpop.eup %443 }
 0x248   :  { %v323_v10 = vmul.f32 %v444_v9, %v320_v8 }
 0x24a   :  { %324 = vst [vmem:[#allocation8] sm:$0xff] %v323_v10 }
 0x24b   :  { %522 = shalt.err (!%p519_p0)
}
 0x24c   :  { %s523_s6 = scalar_lea.hbm %s636_s4, 128 }
 0x24d   :  { %p524_p1 = scmp.ne.s32.totalorder %s636_s4, %s523_s6  ;;  %p527_p2 = scmp.lt.u32.totalorder %s523_s6, %s636_s4 }
 0x24f   :  { %p529_p3 = pnand %p527_p2, %p524_p1 }
 0x251   :  { %532 = shalt.err (!%p529_p3)
}
 0x252   :  { %334 = dma.vmem_to_hbm [thread:$0]  %s332_s28, 128, %s636_s4, [#allocation4]  }
 0x253   :  { %537 = dma.done.wait [#allocation4], 128  }
 0x254   :  { %538 = vsyncadd [#allocation4], 4294967168 }
 0x255   :  { %338 = vsyncpa [#allocation3], 1 }
 0x256   :  { %339 = vsyncpa [#allocation6], 1 }
 0x257   :  { %340 = vsyncpa [#allocation4], 1 }

</bundles_post_ra>
